<compile_context>
chip_gen: v7x
topology: tpu7x:2x2x1
jax: 0.10.0
libtpu: 0.0.40
codegen_flags: <defaults>
</compile_context>

<pallas_src>
import jax
import jax.numpy as jnp
from jax.experimental import pallas as pl
from jax.experimental.pallas import tpu as pltpu

DIM = 2          # module-level `dim` in the PyTorch script
N_HIDDEN = 128   # `n` (scaled down from 1024 for a small runnable example)
P_HIDDEN = 128   # `p`
BATCH = 256
TILE_B = 128     # rows per grid step (sweep 512-2048 at realistic batch sizes)


def _mlp_pair_kernel(x_ref,
                     w1_ref, b1_ref,      # phi[0]: Linear(dim, n), stored as (in, out)
                     w2_ref, b2_ref,      # phi[2]: Linear(n, dim)
                     w23_ref, b23_ref,    # fused:  (w2 @ w3, b2 @ w3 + b3) -> (n, p), (1, p)
                     w4t_ref,             # sol[2] weight transposed: (1, p), lane-dense
                     b4_ref,              # sol[2] bias, scalar in SMEM: (1, 1)
                     yu_ref):             # packed output tile: (TILE_B, DIM + 1)
    x = x_ref[...]                        # (TILE_B, DIM)
    w1 = w1_ref[...]                      # (DIM, N)

    # phi first layer: K=DIM(=2) contraction on the VPU via broadcast-FMA
    # (an MXU matmul would waste 126/128 of the systolic depth).
    h = b1_ref[...]
    for d in range(DIM):
        h = h + x[:, d:d + 1] * w1[d:d + 1, :]          # (TILE_B, N)
    th = jnp.tanh(h)

    # phi second layer: proper n-deep MXU matmul.
    y = jnp.dot(th, w2_ref[...], preferred_element_type=jnp.float32) + b2_ref[...]

    # sol first layer fused through phi's second layer:
    #   tanh(y @ w3 + b3) == tanh(th @ (w2 @ w3) + (b2 @ w3 + b3))
    g = jnp.tanh(jnp.dot(th, w23_ref[...], preferred_element_type=jnp.float32)
                 + b23_ref[...])                         # (TILE_B, P)

    # sol second layer (p -> 1): VPU multiply + lane reduction; keeps the MXU free.
    u = jnp.sum(g * w4t_ref[...], axis=-1, keepdims=True) + b4_ref[0, 0]  # (TILE_B, 1)

    # Fill the packed output tile (single (TILE_B, DIM+1) writeback to HBM).
    yu_ref[:, 0:DIM] = y
    yu_ref[:, DIM:DIM + 1] = u


def mlp_pair(x, params):
    """y, u = M(x) computed in a single batched Pallas kernel."""
    (w1, b1, w2, b2, w3, b3, w4, b4) = params
    B = x.shape[0]
    n = w1.shape[1]
    p = w3.shape[1]

    # Wrapper-side (one-time) weight fusion / layout prep.
    w23 = w2 @ w3                     # (n, p)
    b23 = b2 @ w3 + b3                # (1, p)
    w4t = w4.T                        # (1, p)  lane-dense
    b4s = b4.reshape(1, 1)            # scalar for SMEM

    # Pad batch to a multiple of TILE_B.
    pad = (-B) % TILE_B
    if pad:
        x = jnp.pad(x, ((0, pad), (0, 0)))
    Bp = B + pad
    grid = (Bp // TILE_B,)

    def resident(shape):
        # Whole-array block whose block index never changes -> stays resident in VMEM.
        nd = len(shape)
        return pl.BlockSpec(shape, lambda i, _nd=nd: (0,) * _nd)

    yu = pl.pallas_call(
        _mlp_pair_kernel,
        out_shape=jax.ShapeDtypeStruct((Bp, DIM + 1), jnp.float32),
        grid=grid,
        in_specs=[
            pl.BlockSpec((TILE_B, DIM), lambda i: (i, 0)),       # x row tile
            resident((DIM, n)), resident((1, n)),                # w1, b1
            resident((n, DIM)), resident((1, DIM)),              # w2, b2
            resident((n, p)), resident((1, p)),                  # w23, b23
            resident((1, p)),                                    # w4.T
            pl.BlockSpec(memory_space=pltpu.MemorySpace.SMEM),   # b4 scalar
        ],
        out_specs=pl.BlockSpec((TILE_B, DIM + 1), lambda i: (i, 0)),
        compiler_params=pltpu.CompilerParams(
            dimension_semantics=("parallel",)),   # batch axis sharded across TCs on v7x
    )(x, w1, b1, w2, b2, w23, b23, w4t, b4s)

    yu = yu[:B]
    return yu[:, :DIM], yu[:, DIM:DIM + 1]


def init_params(key, n=N_HIDDEN, p=P_HIDDEN, dim=DIM):
    """Deterministic init mimicking PyTorch Linear default (uniform +-1/sqrt(fan_in)).
    Weights stored as (in, out) so the kernel computes x @ W + b."""
    ks = jax.random.split(key, 8)

    def lin(kw, kb, fan_in, fan_out):
        bound = 1.0 / jnp.sqrt(fan_in)
        w = jax.random.uniform(kw, (fan_in, fan_out), jnp.float32, -bound, bound)
        b = jax.random.uniform(kb, (1, fan_out), jnp.float32, -bound, bound)
        return w, b

    w1, b1 = lin(ks[0], ks[1], dim, n)   # phi[0]: Linear(dim, n)
    w2, b2 = lin(ks[2], ks[3], n, dim)   # phi[2]: Linear(n, dim)
    w3, b3 = lin(ks[4], ks[5], dim, p)   # sol[0]: Linear(dim, p)
    w4, b4 = lin(ks[6], ks[7], p, 1)     # sol[2]: Linear(p, 1)
    return (w1, b1, w2, b2, w3, b3, w4, b4)


def reference(x, params):
    (w1, b1, w2, b2, w3, b3, w4, b4) = params
    y = jnp.tanh(x @ w1 + b1) @ w2 + b2
    u = jnp.tanh(y @ w3 + b3) @ w4 + b4
    return y, u


if __name__ == "__main__":
    key = jax.random.PRNGKey(0)
    k_params, k_x = jax.random.split(key)

    params = init_params(k_params)
    x = jax.random.normal(k_x, (BATCH, DIM), dtype=jnp.float32)

    y, u = jax.jit(mlp_pair)(x, params)
    jax.block_until_ready((y, u))

    y_ref, u_ref = reference(x, params)
    assert y.shape == (BATCH, DIM) and y.dtype == jnp.float32
    assert u.shape == (BATCH, 1) and u.dtype == jnp.float32
    # The w2@w3 fusion slightly reorders f32 round-off on the u path; stays well inside 1e-4.
    assert jnp.allclose(y, y_ref, atol=1e-5, rtol=1e-5)
    assert jnp.allclose(u, u_ref, atol=1e-4, rtol=1e-4)

    print("KERNEL_OK")
</pallas_src>

<mosaic_0001>
module attributes {stable_mosaic.version = 11 : i64} {
  func.func @_mlp_pair_kernel(%arg0: i32, %arg1: memref<128x2xf32, #tpu.memory_space<vmem>>, %arg2: memref<2x128xf32, #tpu.memory_space<vmem>>, %arg3: memref<1x128xf32, #tpu.memory_space<vmem>>, %arg4: memref<128x2xf32, #tpu.memory_space<vmem>>, %arg5: memref<1x2xf32, #tpu.memory_space<vmem>>, %arg6: memref<128x128xf32, #tpu.memory_space<vmem>>, %arg7: memref<1x128xf32, #tpu.memory_space<vmem>>, %arg8: memref<1x128xf32, #tpu.memory_space<vmem>>, %arg9: memref<1x1xf32, #tpu.memory_space<smem>>, %arg10: memref<128x3xf32, #tpu.memory_space<vmem>>) attributes {dimension_semantics = [#tpu.dimension_semantics<parallel>], iteration_bounds = array<i64: 2>, scalar_prefetch = 0 : i64, scratch_operands = 0 : i64, tpu.core_type = #tpu.core_type<tc>, window_params = [{transform_indices = @transform_0, window_bounds = array<i64: 128, 2>}, {pipeline_mode = #tpu.pipeline_mode<synchronous>, transform_indices = @transform_1, window_bounds = array<i64: 2, 128>}, {pipeline_mode = #tpu.pipeline_mode<synchronous>, transform_indices = @transform_2, window_bounds = array<i64: 1, 128>}, {pipeline_mode = #tpu.pipeline_mode<synchronous>, transform_indices = @transform_3, window_bounds = array<i64: 128, 2>}, {pipeline_mode = #tpu.pipeline_mode<synchronous>, transform_indices = @transform_4, window_bounds = array<i64: 1, 2>}, {pipeline_mode = #tpu.pipeline_mode<synchronous>, transform_indices = @transform_5, window_bounds = array<i64: 128, 128>}, {pipeline_mode = #tpu.pipeline_mode<synchronous>, transform_indices = @transform_6, window_bounds = array<i64: 1, 128>}, {pipeline_mode = #tpu.pipeline_mode<synchronous>, transform_indices = @transform_7, window_bounds = array<i64: 1, 128>}, {transform_indices = @transform_8, window_bounds = array<i64: 1, 1>}, {transform_indices = @transform_9, window_bounds = array<i64: 128, 3>}]} {
    %c0 = arith.constant 0 : index
    %c0_0 = arith.constant 0 : index
    %0 = vector.load %arg1[%c0, %c0_0] : memref<128x2xf32, #tpu.memory_space<vmem>>, vector<128x2xf32>
    %c0_1 = arith.constant 0 : index
    %c0_2 = arith.constant 0 : index
    %1 = vector.load %arg2[%c0_1, %c0_2] : memref<2x128xf32, #tpu.memory_space<vmem>>, vector<2x128xf32>
    %c0_3 = arith.constant 0 : index
    %c0_4 = arith.constant 0 : index
    %2 = vector.load %arg3[%c0_3, %c0_4] : memref<1x128xf32, #tpu.memory_space<vmem>>, vector<1x128xf32>
    %3 = vector.extract_strided_slice %0 {offsets = [0, 0], sizes = [128, 1], strides = [1, 1]} : vector<128x2xf32> to vector<128x1xf32>
    %4 = vector.extract_strided_slice %1 {offsets = [0, 0], sizes = [1, 128], strides = [1, 1]} : vector<2x128xf32> to vector<1x128xf32>
    %5 = vector.broadcast %3 : vector<128x1xf32> to vector<128x128xf32>
    %6 = vector.broadcast %4 : vector<1x128xf32> to vector<128x128xf32>
    %7 = arith.mulf %5, %6 : vector<128x128xf32>
    %8 = vector.broadcast %2 : vector<1x128xf32> to vector<128x128xf32>
    %9 = arith.addf %8, %7 : vector<128x128xf32>
    %10 = vector.extract_strided_slice %0 {offsets = [0, 1], sizes = [128, 1], strides = [1, 1]} : vector<128x2xf32> to vector<128x1xf32>
    %11 = vector.extract_strided_slice %1 {offsets = [1, 0], sizes = [1, 128], strides = [1, 1]} : vector<2x128xf32> to vector<1x128xf32>
    %12 = vector.broadcast %10 : vector<128x1xf32> to vector<128x128xf32>
    %13 = vector.broadcast %11 : vector<1x128xf32> to vector<128x128xf32>
    %14 = arith.mulf %12, %13 : vector<128x128xf32>
    %15 = arith.addf %9, %14 : vector<128x128xf32>
    %16 = math.tanh %15 : vector<128x128xf32>
    %c0_5 = arith.constant 0 : index
    %c0_6 = arith.constant 0 : index
    %17 = vector.load %arg4[%c0_5, %c0_6] : memref<128x2xf32, #tpu.memory_space<vmem>>, vector<128x2xf32>
    %cst = arith.constant dense<0.000000e+00> : vector<128x2xf32>
    %18 = tpu.matmul %16, %17, %cst {dimension_numbers = #tpu.dot_dimension_numbers<[1], [0], [0], [1], [0, 0, 1, 1], [], []>} : vector<128x128xf32>, vector<128x2xf32>, vector<128x2xf32> -> vector<128x2xf32>
    %c0_7 = arith.constant 0 : index
    %c0_8 = arith.constant 0 : index
    %19 = vector.load %arg5[%c0_7, %c0_8] : memref<1x2xf32, #tpu.memory_space<vmem>>, vector<1x2xf32>
    %20 = vector.broadcast %19 : vector<1x2xf32> to vector<128x2xf32>
    %21 = arith.addf %18, %20 : vector<128x2xf32>
    %c0_9 = arith.constant 0 : index
    %c0_10 = arith.constant 0 : index
    %22 = vector.load %arg6[%c0_9, %c0_10] : memref<128x128xf32, #tpu.memory_space<vmem>>, vector<128x128xf32>
    %cst_11 = arith.constant dense<0.000000e+00> : vector<128x128xf32>
    %23 = tpu.matmul %16, %22, %cst_11 {dimension_numbers = #tpu.dot_dimension_numbers<[1], [0], [0], [1], [0, 0, 1, 1], [], []>} : vector<128x128xf32>, vector<128x128xf32>, vector<128x128xf32> -> vector<128x128xf32>
    %c0_12 = arith.constant 0 : index
    %c0_13 = arith.constant 0 : index
    %24 = vector.load %arg7[%c0_12, %c0_13] : memref<1x128xf32, #tpu.memory_space<vmem>>, vector<1x128xf32>
    %25 = vector.broadcast %24 : vector<1x128xf32> to vector<128x128xf32>
    %26 = arith.addf %23, %25 : vector<128x128xf32>
    %27 = math.tanh %26 : vector<128x128xf32>
    %c0_14 = arith.constant 0 : index
    %c0_15 = arith.constant 0 : index
    %28 = vector.load %arg8[%c0_14, %c0_15] : memref<1x128xf32, #tpu.memory_space<vmem>>, vector<1x128xf32>
    %29 = vector.broadcast %28 : vector<1x128xf32> to vector<128x128xf32>
    %30 = arith.mulf %27, %29 : vector<128x128xf32>
    %cst_16 = arith.constant dense<0.000000e+00> : vector<128xf32>
    %31 = vector.multi_reduction <add>, %30, %cst_16 [1] : vector<128x128xf32> to vector<128xf32>
    %32 = vector.shape_cast %31 : vector<128xf32> to vector<128x1xf32>
    %c0_17 = arith.constant 0 : index
    %c0_18 = arith.constant 0 : index
    %33 = memref.load %arg9[%c0_17, %c0_18] : memref<1x1xf32, #tpu.memory_space<smem>>
    %34 = vector.broadcast %33 : f32 to vector<128x1xf32>
    %35 = arith.addf %32, %34 : vector<128x1xf32>
    %c0_19 = arith.constant 0 : index
    %c0_20 = arith.constant 0 : index
    %36 = vector.load %arg10[%c0_19, %c0_20] : memref<128x3xf32, #tpu.memory_space<vmem>>, vector<128x2xf32>
    tpu.vector_store %arg10[%c0_19, %c0_20], %21 {strides = array<i32>} : memref<128x3xf32, #tpu.memory_space<vmem>>, vector<128x2xf32>,
    %c0_21 = arith.constant 0 : index
    %c2 = arith.constant 2 : index
    %37 = vector.load %arg10[%c0_21, %c2] : memref<128x3xf32, #tpu.memory_space<vmem>>, vector<128x1xf32>
    tpu.vector_store %arg10[%c0_21, %c2], %35 {strides = array<i32>} : memref<128x3xf32, #tpu.memory_space<vmem>>, vector<128x1xf32>,
    return
  }
  func.func @transform_0(%arg0: i32) -> (i32, i32) {
    %c0_i32 = arith.constant 0 : i32
    %c0_i32_0 = arith.constant 0 : i32
    return %arg0, %c0_i32 : i32, i32
  }
  func.func @transform_1(%arg0: i32) -> (i32, i32) {
    %c0_i32 = arith.constant 0 : i32
    %c0_i32_0 = arith.constant 0 : i32
    %c0_i32_1 = arith.constant 0 : i32
    return %c0_i32, %c0_i32_0 : i32, i32
  }
  func.func @transform_2(%arg0: i32) -> (i32, i32) {
    %c0_i32 = arith.constant 0 : i32
    %c0_i32_0 = arith.constant 0 : i32
    %c0_i32_1 = arith.constant 0 : i32
    return %c0_i32, %c0_i32_0 : i32, i32
  }
  func.func @transform_3(%arg0: i32) -> (i32, i32) {
    %c0_i32 = arith.constant 0 : i32
    %c0_i32_0 = arith.constant 0 : i32
    %c0_i32_1 = arith.constant 0 : i32
    return %c0_i32, %c0_i32_0 : i32, i32
  }
  func.func @transform_4(%arg0: i32) -> (i32, i32) {
    %c0_i32 = arith.constant 0 : i32
    %c0_i32_0 = arith.constant 0 : i32
    %c0_i32_1 = arith.constant 0 : i32
    return %c0_i32, %c0_i32_0 : i32, i32
  }
  func.func @transform_5(%arg0: i32) -> (i32, i32) {
    %c0_i32 = arith.constant 0 : i32
    %c0_i32_0 = arith.constant 0 : i32
    %c0_i32_1 = arith.constant 0 : i32
    return %c0_i32, %c0_i32_0 : i32, i32
  }
  func.func @transform_6(%arg0: i32) -> (i32, i32) {
    %c0_i32 = arith.constant 0 : i32
    %c0_i32_0 = arith.constant 0 : i32
    %c0_i32_1 = arith.constant 0 : i32
    return %c0_i32, %c0_i32_0 : i32, i32
  }
  func.func @transform_7(%arg0: i32) -> (i32, i32) {
    %c0_i32 = arith.constant 0 : i32
    %c0_i32_0 = arith.constant 0 : i32
    %c0_i32_1 = arith.constant 0 : i32
    return %c0_i32, %c0_i32_0 : i32, i32
  }
  func.func @transform_8(%arg0: i32) -> (i32, i32) {
    %c0_i32 = arith.constant 0 : i32
    %c0_i32_0 = arith.constant 0 : i32
    %c0_i32_1 = arith.constant 0 : i32
    return %c0_i32, %c0_i32_0 : i32, i32
  }
  func.func @transform_9(%arg0: i32) -> (i32, i32) {
    %c0_i32 = arith.constant 0 : i32
    %c0_i32_0 = arith.constant 0 : i32
    return %arg0, %c0_i32 : i32, i32
  }
}

</mosaic_0001>

<bundles_post_ra>
// kernel: mlp_pair.1
= control target key start
LH: loop header
LB: loop body
LE: loop exit
PB: predicated region body
PF: predicated region fallthrough
CT: control target
= control target key end

     0   :  { %s1518_s11 = smov 0   ;;  %s1878_s0 = inlined_call_operand.vmem [shape: f32[256,2], index: 0, kind: input, shape index: {}]   ;;  %s1879_s1 = inlined_call_operand.vmem [shape: f32[2,128], index: 1, kind: input, shape index: {}]   ;;  %s1880_s2 = inlined_call_operand.vmem [shape: f32[1,128], index: 2, kind: input, shape index: {}]   ;;  %s1881_s3 = inlined_call_operand.vmem [shape: f32[128,2], index: 3, kind: input, shape index: {}]   ;;  %s1882_s4 = inlined_call_operand.vmem [shape: f32[1,2], index: 4, kind: input, shape index: {}]   ;;  %s1883_s5 = inlined_call_operand.vmem [shape: f32[128,128], index: 5, kind: input, shape index: {}]   ;;  %s1884_s6 = inlined_call_operand.vmem [shape: f32[1,128], index: 6, kind: input, shape index: {}]   ;;  %s1885_s7 = inlined_call_operand.vmem [shape: f32[1,128], index: 7, kind: input, shape index: {}]   ;;  %s1886_s8 = inlined_call_operand.<no memory space> [shape: f32[1,1], index: 8, kind: input, shape index: {}]   ;;  %s1887_s9 = inlined_call_operand.vmem [shape: f32[256,3], index: 9, kind: output, shape index: {}]  }
   0x1   :  { %14 = sst [smem:[#allocation2]] %s1886_s8 }
   0x2 LB: > { %s1108_s12 = sadd.s32 4294967295, %s1461_s11   ;;  %p1112_p0 = scmp.ge.s32.totalorder %s1461_s11, 1  ;;  %s1461_s11 = sphi %s1518_s11, %s20_s11  }
   0x3   : > { %p289_p1 = scmp.lt.s32.totalorder %s1461_s11, 3 }
   0x5   : > { %p290_p2 = pnand %p1112_p0, %p289_p1 }
   0x6   : > { %s1113_s13 = sshll.u32 (!%p290_p2), %s1108_s12, 4  ;;  %v1463_v0 = vmov (!%p290_p2), 1   ;;  %v593_v7 = vld [vmem:[%s1881_s3] sm:$0xff] (!%p290_p2)  ;;  %v594_v8 = vld [vmem:[%s1881_s3 + $0x8] sm:$0xff] (!%p290_p2)  ;;  %v595_v12 = vld [vmem:[%s1881_s3 + $0x10] sm:$0xff] (!%p290_p2)  ;;  %v1464_v19 = vmov (!%p290_p2), 0  }
   0x7   : > { %293 = sbr.rel (%p290_p2) target bundleno = 620 (0x26c), region = 56  ;;  %1375 = vset.pattern.permute.xlu0 (!%p290_p2), %v1463_v0  ;;  %1373 = vset.pattern.permute.xlu1 (!%p290_p2), %v1463_v0  ;;  %p326_p3 = scmp.lt.s32.totalorder (!%p290_p2), %s1113_s13, 31  ;;  %v1299_v9 = vpack.c.bf16 (!%p290_p2), %v594_v8, %v593_v7  ;;  %v761_v10 = vld [vmem:[%s1883_s5] sm:$0xff] (!%p290_p2)  ;;  %v762_v11 = vld [vmem:[%s1883_s5 + $0x8] sm:$0xff] (!%p290_p2)  ;;  %v596_v14 = vld [vmem:[%s1881_s3 + $0x18] sm:$0xff] (!%p290_p2)  ;;  %vm1018_vm0 = vcmask (!%p290_p2), 15360  }
   0x8   : > { %v1331_v13 = vpack.c.bf16 (!%p290_p2), %v762_v11, %v761_v10  ;;  %v763_v15 = vld [vmem:[%s1883_s5 + $0x10] sm:$0xff] (!%p290_p2)  ;;  %v764_v16 = vld [vmem:[%s1883_s5 + $0x18] sm:$0xff] (!%p290_p2)  ;;  %v1303_v17 = vpack.c.bf16 (!%p290_p2), %v596_v14, %v595_v12  ;;  %v597_v20 = vld [vmem:[%s1881_s3 + $0x20] sm:$0xff] (!%p290_p2)  ;;  %s1000_s19 = sld [smem:[#allocation2]] (!%p290_p2)  ;;  %vm1035_vm1 = vcmask (!%p290_p2), 23568  }
   0x9   : > { %1300 = vmatprep.subr.bf16.mxu0 (!%p290_p2), %v1299_v9  ;;  %v1335_v18 = vpack.c.bf16 (!%p290_p2), %v764_v16, %v763_v15  ;;  %v598_v21 = vld [vmem:[%s1881_s3 + $0x28] sm:$0xff] (!%p290_p2)  ;;  %v765_v22 = vld [vmem:[%s1883_s5 + $0x20] sm:$0xff] (!%p290_p2)  ;;  %v599_v26 = vld [vmem:[%s1881_s3 + $0x30] sm:$0xff] (!%p290_p2) }
   0xa   : > { %1332 = vmatprep.subr.bf16.mxu1 (!%p290_p2), %v1331_v13  ;;  %v766_v23 = vld [vmem:[%s1883_s5 + $0x28] sm:$0xff] (!%p290_p2)  ;;  %1302 = vmatpush3.bf16.msra.mxu0 (!%p290_p2), %v1299_v9  ;;  %v1307_v24 = vpack.c.bf16 (!%p290_p2), %v598_v21, %v597_v20  ;;  %v600_v27 = vld [vmem:[%s1881_s3 + $0x38] sm:$0xff] (!%p290_p2)  ;;  %v767_v28 = vld [vmem:[%s1883_s5 + $0x30] sm:$0xff] (!%p290_p2) }
   0xb   : > { %1334 = vmatpush3.bf16.msra.mxu1 (!%p290_p2), %v1331_v13  ;;  %1304 = vmatprep.subr.bf16.mxu0 (!%p290_p2), %v1303_v17  ;;  %v1339_v25 = vpack.c.bf16 (!%p290_p2), %v766_v23, %v765_v22  ;;  %v768_v29 = vld [vmem:[%s1883_s5 + $0x38] sm:$0xff] (!%p290_p2)  ;;  %v1311_v31 = vpack.c.bf16 (!%p290_p2), %v600_v27, %v599_v26  ;;  %v601_v33 = vld [vmem:[%s1881_s3 + $0x40] sm:$0xff] (!%p290_p2)  ;;  %v602_v34 = vld [vmem:[%s1881_s3 + $0x48] sm:$0xff] (!%p290_p2) }
   0xc   : > { %1336 = vmatprep.subr.bf16.mxu1 (!%p290_p2), %v1335_v18  ;;  %v1343_v32 = vpack.c.bf16 (!%p290_p2), %v768_v29, %v767_v28  ;;  %v769_v35 = vld [vmem:[%s1883_s5 + $0x40] sm:$0xff] (!%p290_p2)  ;;  %v770_v36 = vld [vmem:[%s1883_s5 + $0x48] sm:$0xff] (!%p290_p2)  ;;  %v1315_v37 = vpack.c.bf16 (!%p290_p2), %v602_v34, %v601_v33  ;;  %v603_v38 = vld [vmem:[%s1881_s3 + $0x50] sm:$0xff] (!%p290_p2) }
   0xd   : > { %v604_v39 = vld [vmem:[%s1881_s3 + $0x58] sm:$0xff] (!%p290_p2)  ;;  %v1347_v40 = vpack.c.bf16 (!%p290_p2), %v770_v36, %v769_v35  ;;  %v771_v41 = vld [vmem:[%s1883_s5 + $0x50] sm:$0xff] (!%p290_p2)  ;;  %v605_v46 = vld [vmem:[%s1881_s3 + $0x60] sm:$0xff] (!%p290_p2) }
   0xe   : > { %s1889_s13 = smov (!%p326_p3, %s1113_s13), 31  ;;  %1306 = vmatpush3.bf16.msra.mxu0 %v1303_v17  ;;  %v772_v42 = vld [vmem:[%s1883_s5 + $0x58] sm:$0xff]  ;;  %v1319_v44 = vpack.c.bf16 %v604_v39, %v603_v38  ;;  %v606_v47 = vld [vmem:[%s1881_s3 + $0x68] sm:$0xff]  ;;  %v773_v48 = vld [vmem:[%s1883_s5 + $0x60] sm:$0xff] }
   0xf   : > { %s1114_s8 = sshll.u32 %s1889_s13, 3  ;;  %1338 = vmatpush3.bf16.msra.mxu1 %v1335_v18  ;;  %1308 = vmatprep.subr.bf16.mxu0 %v1307_v24  ;;  %v1351_v45 = vpack.c.bf16 %v772_v42, %v771_v41  ;;  %v774_v49 = vld [vmem:[%s1883_s5 + $0x68] sm:$0xff]  ;;  %v1323_v50 = vpack.c.bf16 %v606_v47, %v605_v46  ;;  %v607_v52 = vld [vmem:[%s1881_s3 + $0x70] sm:$0xff]  ;;  %v608_v53 = vld [vmem:[%s1881_s3 + $0x78] sm:$0xff] }
  0x10   : > { %s1536_s16 = scalar_lea.vmem %s1878_s0, %s1114_s8  ;;  %1340 = vmatprep.subr.bf16.mxu1 %v1339_v25  ;;  %v1355_v51 = vpack.c.bf16 %v774_v49, %v773_v48  ;;  %v775_v54 = vld [vmem:[%s1883_s5 + $0x70] sm:$0xff]  ;;  %v776_v55 = vld [vmem:[%s1883_s5 + $0x78] sm:$0xff]  ;;  %v1327_v58 = vpack.c.bf16 %v608_v53, %v607_v52  ;;  %v353_v12 = vld [vmem:[%s1879_s1] sm:$0x3]  ;;  %s1756_s18 = scalar_lea.vmem %s1887_s9, %s1114_s8 }
  0x11   : > { %v1539_v1 = vld [vmem:[%s1536_s16 + $0x10] sm:$0xff]  ;;  %v337_v2 = vld [vmem:[%s1536_s16] sm:$0xff]  ;;  %v338_v4 = vld [vmem:[%s1536_s16 + $0x8] sm:$0xff]  ;;  %v1359_v59 = vpack.c.bf16 %v776_v55, %v775_v54 }
  0x12   : > { %486 = vperm.xlu0 %1375, %v1539_v1   ;;  %478 = vperm.xlu1 %1373, %v337_v2   ;;  %v1544_v3 = vld [vmem:[%s1536_s16 + $0x30] sm:$0xff]  ;;  %v340_v6 = vld [vmem:[%s1536_s16 + $0x18] sm:$0xff]  ;;  %v341_v30 = vld [vmem:[%s1536_s16 + $0x20] sm:$0xff] }
  0x13   : > { %v1548_v5 = vld [vmem:[%s1536_s16 + $0x50] sm:$0xff]  ;;  %1310 = vmatpush3.bf16.msra.mxu0 %v1307_v24  ;;  %1342 = vmatpush3.bf16.msra.mxu1 %v1339_v25  ;;  %v342_v43 = vld [vmem:[%s1536_s16 + $0x28] sm:$0xff]  ;;  %v344_v57 = vld [vmem:[%s1536_s16 + $0x38] sm:$0xff] }
  0x14   : > { %1312 = vmatprep.subr.bf16.mxu0 %v1311_v31  ;;  %1344 = vmatprep.subr.bf16.mxu1 %v1343_v32  ;;  %v346_v56 = vld [vmem:[%s1536_s16 + $0x48] sm:$0xff]  ;;  %v345_v61 = vld [vmem:[%s1536_s16 + $0x40] sm:$0xff]  ;;  %v351_v62 = vld [vmem:[%s1536_s16 + $0x70] sm:$0xff] }
  0x15   : > { %v350_v60 = vld [vmem:[%s1536_s16 + $0x68] sm:$0xff]  ;;  %v348_v63 = vld [vmem:[%s1536_s16 + $0x58] sm:$0xff]  ;;  %v1691_v18 = vld [vmem:[%s1880_s2] ss:$0 sm:$0xff] }
  0x16   : > { %502 = vperm.xlu0 %1375, %v1544_v3   ;;  %482 = vperm.xlu1 %1373, %v338_v4  }
  0x17   : > { %1314 = vmatpush3.bf16.msra.mxu0 %v1311_v31  ;;  %1346 = vmatpush3.bf16.msra.mxu1 %v1343_v32 }
  0x18   : > { %1316 = vmatprep.subr.bf16.mxu0 %v1315_v37  ;;  %1348 = vmatprep.subr.bf16.mxu1 %v1347_v40 }
  0x1a   : > { %518 = vperm.xlu0 %1375, %v1548_v5   ;;  %1374 = vset.pattern.permute.xlu1 %v1464_v19 }
  0x1b   : > { %372 = vperm.xlu1 %1374, %v340_v6   ;;  %1318 = vmatpush3.bf16.msra.mxu0 %v1315_v37 }
  0x1c   : > { %1350 = vmatpush3.bf16.msra.mxu1 %v1347_v40  ;;  %1320 = vmatprep.subr.bf16.mxu0 %v1319_v44 }
  0x1d   : > { %1352 = vmatprep.subr.bf16.mxu1 %v1351_v45 }
  0x1e   : > { %1384 = vset.pattern.permute.xlu0 %v1464_v19 }
  0x1f   : > { %357 = vperm.xlu0 %1384, %v337_v2   ;;  %1376 = vset.pattern.permute.xlu1 %v1463_v0  ;;  %v352_v2 = vld [vmem:[%s1536_s16 + $0x78] sm:$0xff] }
  0x20   : > { %490 = vperm.xlu1 %1376, %v340_v6   ;;  %1322 = vmatpush3.bf16.msra.mxu0 %v1319_v44 }
  0x21   : > { %1354 = vmatpush3.bf16.msra.mxu1 %v1351_v45  ;;  %1324 = vmatprep.subr.bf16.mxu0 %v1323_v50 }
  0x22   : > { %1356 = vmatprep.subr.bf16.mxu1 %v1355_v51 }
  0x23   : > { %362 = vperm.xlu0 %1384, %v338_v4  }
  0x24   : > { %1377 = vset.pattern.permute.xlu1 %v1464_v19  ;;  %1326 = vmatpush3.bf16.msra.mxu0 %v1323_v50 }
  0x25   : > { %377 = vperm.xlu1 %1377, %v341_v30   ;;  %1358 = vmatpush3.bf16.msra.mxu1 %v1355_v51 }
  0x26   : > { %1328 = vmatprep.subr.bf16.mxu0 %v1327_v58  ;;  %1360 = vmatprep.subr.bf16.mxu1 %v1359_v59 }
  0x27   : > { %367 = vperm.xlu0 %1384, %v1539_v1   ;;  %v349_v1 = vld [vmem:[%s1536_s16 + $0x60] sm:$0xff] }
  0x28   : > { %1330 = vmatpush3.bf16.msra.mxu0 %v1327_v58 }
  0x29   : > { %1378 = vset.pattern.permute.xlu1 %v1463_v0  ;;  %1362 = vmatpush3.bf16.msra.mxu1 %v1359_v59 }
  0x2a   : > { %494 = vperm.xlu1 %1378, %v341_v30  }
  0x2b   : > { %382 = vperm.xlu0 %1384, %v342_v43  }
  0x2e   : > { %498 = vperm.xlu1 %1378, %v342_v43  }
  0x2f   : > { %387 = vperm.xlu0 %1384, %v1544_v3   ;;  %v435_v3 = vlaneseq }
  0x31   : > { %v436_v6 = vshrl.u32 %v435_v3, 7 }
  0x32   : > { %1379 = vset.pattern.permute.xlu1 %v1464_v19 }
  0x33   : > { %402 = vperm.xlu0 %1384, %v346_v56   ;;  %392 = vperm.xlu1 %1379, %v344_v57   ;;  %v543_v9 = vsub.s32 1, %v436_v6  ;;  %v437_v11 = vsub.s32 0, %v436_v6 }
  0x35   : > { %v1683_v14 = vrot.slane %v353_v12, %v543_v9  ;;  %v1685_v15 = vrot.slane %v353_v12, %v437_v11 }
  0x37   : > { %407 = vperm.xlu0 %1384, %v1548_v5   ;;  %1380 = vset.pattern.permute.xlu1 %v1463_v0 }
  0x38   : > { %506 = vperm.xlu1 %1380, %v344_v57  }
  0x3b   : > { %422 = vperm.xlu0 %1384, %v350_v60  }
  0x3c   : > { %1381 = vset.pattern.permute.xlu1 %v1464_v19 }
  0x3d   : > { %397 = vperm.xlu1 %1381, %v345_v61  }
  0x3f   : > { %427 = vperm.xlu0 %1384, %v351_v62  }
  0x41   : > { %1382 = vset.pattern.permute.xlu1 %v1463_v0 }
  0x42   : > { %510 = vperm.xlu1 %1382, %v345_v61  }
  0x43   : > { %1389 = vset.pattern.permute.xlu0 %v1463_v0 }
  0x44   : > { %534 = vperm.xlu0 %1389, %v351_v62  }
  0x46   : > { %514 = vperm.xlu1 %1382, %v346_v56  }
  0x4a   : > { %1383 = vset.pattern.permute.xlu1 %v1464_v19 }
  0x4b   : > { %412 = vperm.xlu1 %1383, %v348_v63  }
  0x4f   : > { %1385 = vset.pattern.permute.xlu1 %v1463_v0 }
  0x50   : > { %522 = vperm.xlu1 %1385, %v348_v63  }
  0x54   : > { %1386 = vset.pattern.permute.xlu1 %v1464_v19 }
  0x55   : > { %417 = vperm.xlu1 %1386, %v349_v1  }
  0x59   : > { %1387 = vset.pattern.permute.xlu1 %v1463_v0 }
  0x5a   : > { %526 = vperm.xlu1 %1387, %v349_v1  }
  0x5e   : > { %530 = vperm.xlu1 %1387, %v350_v60  }
  0x62   : > { %1388 = vset.pattern.permute.xlu1 %v1464_v19 }
  0x63   : > { %432 = vperm.xlu1 %1388, %v352_v2  }
  0x67   : > { %1390 = vset.pattern.permute.xlu1 %v1463_v0 }
  0x68   : > { %538 = vperm.xlu1 %1390, %v352_v2  }
  0x91   : > { %v479_v4 = vpop.permute.xlu1 %478  ;;  %v487_v5 = vpop.permute.xlu0 %486 }
  0x92   : > { %v545_v19 = vmul.f32 %v1683_v14, %v479_v4  ;;  %v547_v32 = vmul.f32 %v1683_v14, %v487_v5 }
  0x95   : > { %v483_v7 = vpop.permute.xlu1 %482  ;;  %v503_v8 = vpop.permute.xlu0 %502 }
  0x96   : > { %v546_v27 = vmul.f32 %v1683_v14, %v483_v7  ;;  %v551_v49 = vmul.f32 %v1683_v14, %v503_v8 }
  0x99   : > { %v1678_v10 = vpop.permute.xlu0 %518 }
  0x9a   : > { %v373_v13 = vpop.permute.xlu1 %372 }
  0x9b   : > { %v442_v21 = vmul.f32 %v1685_v15, %v373_v13 }
  0x9d   : > { %v464_v29 = vadd.f32 %v1691_v18, %v442_v21 }
  0x9e   : > { %v358_v0 = vpop.permute.xlu0 %357 }
  0x9f   : > { %v439_v16 = vmul.f32 %v1685_v15, %v358_v0  ;;  %v491_v17 = vpop.permute.xlu1 %490 }
  0xa0   : > { %v548_v25 = vmul.f32 %v1683_v14, %v491_v17 }
  0xa1   : > { %v461_v20 = vadd.f32 %v1691_v18, %v439_v16  ;;  %v555_v16 = vmul.f32 %v1683_v14, %v1678_v10 }
  0xa2   : > { %v363_v22 = vpop.permute.xlu0 %362  ;;  %v564_v35 = vadd.f32 %v548_v25, %v464_v29 }
  0xa3   : > { %v561_v23 = vadd.f32 %v545_v19, %v461_v20  ;;  %v440_v24 = vmul.f32 %v1685_v15, %v363_v22 }
  0xa4   : > { %v378_v26 = vpop.permute.xlu1 %377 }
  0xa5   : > { %1391 = vtanh.f32 %v561_v23  ;;  %v462_v28 = vadd.f32 %v1691_v18, %v440_v24  ;;  %v443_v30 = vmul.f32 %v1685_v15, %v378_v26 }
  0xa6   : > { %v368_v31 = vpop.permute.xlu0 %367 }
  0xa7   : > { %v562_v33 = vadd.f32 %v546_v27, %v462_v28  ;;  %v441_v34 = vmul.f32 %v1685_v15, %v368_v31  ;;  %v465_v38 = vadd.f32 %v1691_v18, %v443_v30 }
  0xa9   : > { %1393 = vtanh.f32 %v562_v33  ;;  %v463_v36 = vadd.f32 %v1691_v18, %v441_v34  ;;  %v495_v37 = vpop.permute.xlu1 %494 }
  0xaa   : > { %v549_v39 = vmul.f32 %v1683_v14, %v495_v37  ;;  %v383_v40 = vpop.permute.xlu0 %382  ;;  %1395 = vtanh.f32 %v564_v35 }
  0xab   : > { %v563_v41 = vadd.f32 %v547_v32, %v463_v36  ;;  %v444_v42 = vmul.f32 %v1685_v15, %v383_v40 }
  0xac   : > { %v565_v43 = vadd.f32 %v549_v39, %v465_v38 }
  0xad   : > { %1397 = vtanh.f32 %v563_v41  ;;  %v466_v44 = vadd.f32 %v1691_v18, %v444_v42  ;;  %v499_v45 = vpop.permute.xlu1 %498 }
  0xae   : > { %1399 = vtanh.f32 %v565_v43  ;;  %v550_v46 = vmul.f32 %v1683_v14, %v499_v45  ;;  %v388_v47 = vpop.permute.xlu0 %387 }
  0xaf   : > { %v1392_v48 = vpop.eup %1391  ;;  %v445_v50 = vmul.f32 %v1685_v15, %v388_v47 }
  0xb0   : > { %v566_v51 = vadd.f32 %v550_v46, %v466_v44  ;;  %1219 = vmatprep.mubr.f32.mxu0 %v1392_v48  ;;  %1275 = vmatprep.mubr.f32.mxu1 %v1392_v48 }
  0xb1   : > { %v467_v52 = vadd.f32 %v1691_v18, %v445_v50 }
  0xb2   : > { %1401 = vtanh.f32 %v566_v51  ;;  %v393_v53 = vpop.permute.xlu1 %392  ;;  %v403_v58 = vpop.permute.xlu0 %402 }
  0xb3   : > { %v1394_v54 = vpop.eup %1393  ;;  %v567_v55 = vadd.f32 %v551_v49, %v467_v52  ;;  %v446_v56 = vmul.f32 %v1685_v15, %v393_v53  ;;  %v448_v9 = vmul.f32 %v1685_v15, %v403_v58 }
  0xb4   : > { %1220 = vmatmul.mubr.f32.vlgmr.msra.gmra.mrb[0].mxu0 %v1394_v54  ;;  %1276 = vmatmul.mubr.f32.vlgmr.msra.gmra.mrb[0].mxu1 %v1394_v54  ;;  %v1396_v57 = vpop.eup %1395 }
  0xb5   : > { %1403 = vtanh.f32 %v567_v55  ;;  %v468_v62 = vadd.f32 %v1691_v18, %v446_v56  ;;  %v470_v20 = vadd.f32 %v1691_v18, %v448_v9 }
  0xb6   : > { %v408_v3 = vpop.permute.xlu0 %407 }
  0xb7   : > { %v1398_v59 = vpop.eup %1397  ;;  %v507_v60 = vpop.permute.xlu1 %506  ;;  %v449_v7 = vmul.f32 %v1685_v15, %v408_v3 }
  0xb8   : > { %v1400_v61 = vpop.eup %1399  ;;  %v552_v63 = vmul.f32 %v1683_v14, %v507_v60  ;;  %1222 = vmatprep.mubr.f32.mxu0 %v1398_v59  ;;  %1278 = vmatprep.mubr.f32.mxu1 %v1398_v59 }
  0xb9   : > { %1223 = vmatmul.mubr.f32.gmra.mrb[2].mxu0 %v1396_v57  ;;  %1279 = vmatmul.mubr.f32.gmra.mrb[2].mxu1 %v1396_v57  ;;  %v471_v13 = vadd.f32 %v1691_v18, %v449_v7 }
  0xba   : > { %v568_v1 = vadd.f32 %v552_v63, %v468_v62  ;;  %1225 = vmatprep.mubr.f32.mxu0 %v1400_v61  ;;  %1281 = vmatprep.mubr.f32.mxu1 %v1400_v61  ;;  %v423_v25 = vpop.permute.xlu0 %422 }
  0xbb   : > { %v571_v22 = vadd.f32 %v555_v16, %v471_v13  ;;  %v452_v39 = vmul.f32 %v1685_v15, %v423_v25 }
  0xbc   : > { %v1402_v2 = vpop.eup %1401  ;;  %1405 = vtanh.f32 %v568_v1  ;;  %v398_v4 = vpop.permute.xlu1 %397 }
  0xbd   : > { %1226 = vmatmul.mubr.f32.gmra.mrb[4].mxu0 %v1402_v2  ;;  %1282 = vmatmul.mubr.f32.gmra.mrb[4].mxu1 %v1402_v2  ;;  %v447_v5 = vmul.f32 %v1685_v15, %v398_v4  ;;  %v474_v47 = vadd.f32 %v1691_v18, %v452_v39 }
  0xbe   : > { %v428_v30 = vpop.permute.xlu0 %427 }
  0xbf   : > { %v1404_v6 = vpop.eup %1403  ;;  %v469_v11 = vadd.f32 %v1691_v18, %v447_v5  ;;  %v453_v36 = vmul.f32 %v1685_v15, %v428_v30 }
  0xc0   : > { %1228 = vmatprep.mubr.f32.mxu0 %v1404_v6  ;;  %1284 = vmatprep.mubr.f32.mxu1 %v1404_v6 }
  0xc1   : > { %v511_v8 = vpop.permute.xlu1 %510  ;;  %v475_v42 = vadd.f32 %v1691_v18, %v453_v36 }
  0xc2   : > { %v553_v12 = vmul.f32 %v1683_v14, %v511_v8 }
  0xc3   : > { %v535_v37 = vpop.permute.xlu0 %534 }
  0xc4   : > { %v569_v0 = vadd.f32 %v553_v12, %v469_v11  ;;  %v559_v43 = vmul.f32 %v1683_v14, %v535_v37 }
  0xc5   : > { %v515_v17 = vpop.permute.xlu1 %514 }
  0xc6   : > { %v1406_v19 = vpop.eup %1405  ;;  %1407 = vtanh.f32 %v569_v0  ;;  %v554_v21 = vmul.f32 %v1683_v14, %v515_v17  ;;  %v575_v49 = vadd.f32 %v559_v43, %v475_v42 }
  0xc7   : > { %1229 = vmatmul.mubr.f32.gmra.mrb[6].mxu0 %v1406_v19  ;;  %1285 = vmatmul.mubr.f32.gmra.mrb[6].mxu1 %v1406_v19 }
  0xc8   : > { %v570_v23 = vadd.f32 %v554_v21, %v470_v20 }
  0xca   : > { %1409 = vtanh.f32 %v570_v23  ;;  %v413_v24 = vpop.permute.xlu1 %412 }
  0xcb   : > { %1411 = vtanh.f32 %v571_v22  ;;  %v450_v26 = vmul.f32 %v1685_v15, %v413_v24  ;;  %v1781_v24 = vld [vmem:[%s1885_s7] ss:$0 sm:$0xff] }
  0xcd   : > { %v472_v10 = vadd.f32 %v1691_v18, %v450_v26 }
  0xcf   : > { %v523_v27 = vpop.permute.xlu1 %522 }
  0xd0   : > { %v1408_v28 = vpop.eup %1407  ;;  %v556_v29 = vmul.f32 %v1683_v14, %v523_v27 }
  0xd1   : > { %1231 = vmatprep.mubr.f32.mxu0 %v1408_v28  ;;  %1287 = vmatprep.mubr.f32.mxu1 %v1408_v28 }
  0xd2   : > { %v572_v31 = vadd.f32 %v556_v29, %v472_v10 }
  0xd4   : > { %v1410_v32 = vpop.eup %1409  ;;  %1413 = vtanh.f32 %v572_v31  ;;  %v418_v33 = vpop.permute.xlu1 %417 }
  0xd5   : > { %v1412_v34 = vpop.eup %1411  ;;  %1232 = vmatmul.mubr.f32.gmra.mrb[8].mxu0 %v1410_v32  ;;  %1288 = vmatmul.mubr.f32.gmra.mrb[8].mxu1 %v1410_v32  ;;  %v451_v35 = vmul.f32 %v1685_v15, %v418_v33 }
  0xd6   : > { %1234 = vmatprep.mubr.f32.mxu0 %v1412_v34  ;;  %1290 = vmatprep.mubr.f32.mxu1 %v1412_v34 }
  0xd7   : > { %v473_v40 = vadd.f32 %v1691_v18, %v451_v35 }
  0xd9   : > { %v527_v38 = vpop.permute.xlu1 %526 }
  0xda   : > { %v557_v41 = vmul.f32 %v1683_v14, %v527_v38 }
  0xdc   : > { %v573_v44 = vadd.f32 %v557_v41, %v473_v40 }
  0xdd   : > { %v531_v45 = vpop.permute.xlu1 %530 }
  0xde   : > { %v1414_v46 = vpop.eup %1413  ;;  %1415 = vtanh.f32 %v573_v44  ;;  %v558_v48 = vmul.f32 %v1683_v14, %v531_v45 }
  0xdf   : > { %1235 = vmatmul.mubr.f32.gmra.mrb[10].mxu0 %v1414_v46  ;;  %1291 = vmatmul.mubr.f32.gmra.mrb[10].mxu1 %v1414_v46 }
  0xe0   : > { %v574_v50 = vadd.f32 %v558_v48, %v474_v47 }
  0xe2   : > { %1417 = vtanh.f32 %v574_v50  ;;  %v433_v51 = vpop.permute.xlu1 %432 }
  0xe3   : > { %1419 = vtanh.f32 %v575_v49  ;;  %v454_v52 = vmul.f32 %v1685_v15, %v433_v51  ;;  %v1744_v15 = vld [vmem:[%s1882_s4] ss:$0 sm:$0xff] }
  0xe5   : > { %v476_v55 = vadd.f32 %v1691_v18, %v454_v52 }
  0xe7   : > { %v539_v53 = vpop.permute.xlu1 %538 }
  0xe8   : > { %v1416_v54 = vpop.eup %1415  ;;  %v560_v56 = vmul.f32 %v1683_v14, %v539_v53  ;;  %v1749_v14 = vld [vmem:[%s1884_s6] ss:$0 sm:$0xff] }
  0xe9   : > { %1237 = vmatprep.mubr.f32.mxu0 %v1416_v54  ;;  %1293 = vmatprep.mubr.f32.mxu1 %v1416_v54 }
  0xea   : > { %v576_v57 = vadd.f32 %v560_v56, %v476_v55 }
  0xec   : > { %v1418_v58 = vpop.eup %1417  ;;  %1421 = vtanh.f32 %v576_v57 }
  0xed   : > { %v1420_v59 = vpop.eup %1419  ;;  %1238 = vmatmul.mubr.f32.gmra.mrb[12].mxu0 %v1418_v58  ;;  %1294 = vmatmul.mubr.f32.gmra.mrb[12].mxu1 %v1418_v58 }
  0xee   : > { %1240 = vmatprep.mubr.f32.mxu0 %v1420_v59  ;;  %1296 = vmatprep.mubr.f32.mxu1 %v1420_v59 }
  0xf6   : > { %v1422_v60 = vpop.eup %1421 }
  0xf7   : > { %1241 = vmatmul.mubr.f32.gmra.mrb[14].mxu0 %v1422_v60  ;;  %1297 = vmatmul.mubr.f32.gmra.mrb[14].mxu1 %v1422_v60 }
 0x187   : > { %v1221_v18 = vpop.f32.mrb[0].mxu0  ;;  %v1277_v61 = vpop.f32.mrb[0].mxu1 }
 0x188   : > { %v688_v62 = vadd.f32 %v1221_v18, %v1744_v15  ;;  %v856_v63 = vadd.f32 %v1277_v61, %v1749_v14  ;;  %v682_v1 = vpop.f32.mrb[1].mxu0  ;;  %v850_v2 = vpop.f32.mrb[1].mxu1 }
 0x189   : > { %v683_v3 = vadd.f32 %v1744_v15, %v682_v1  ;;  %v851_v4 = vadd.f32 %v1749_v14, %v850_v2 }
 0x18a   : > { %1020 = vst.msk [vmem:[%s1756_s18 + $0x8] sm:$0xff] %vm1018_vm0, %v688_v62  ;;  %1423 = vtanh.f32 %v856_v63 }
 0x18b   : > { %1019 = vst.msk [vmem:[%s1756_s18] sm:$0xff] %vm1018_vm0, %v683_v3  ;;  %1425 = vtanh.f32 %v851_v4 }
 0x18c   : > { %v1224_v5 = vpop.f32.mrb[2].mxu0  ;;  %v1280_v6 = vpop.f32.mrb[2].mxu1 }
 0x18d   : > { %v698_v7 = vadd.f32 %v1224_v5, %v1744_v15  ;;  %v866_v8 = vadd.f32 %v1280_v6, %v1749_v14  ;;  %v692_v9 = vpop.f32.mrb[3].mxu0  ;;  %v860_v11 = vpop.f32.mrb[3].mxu1 }
 0x18e   : > { %v693_v12 = vadd.f32 %v1744_v15, %v692_v9  ;;  %v861_v13 = vadd.f32 %v1749_v14, %v860_v11 }
 0x18f   : > { %1022 = vst.msk [vmem:[%s1756_s18 + $0x18] sm:$0xff] %vm1018_vm0, %v698_v7  ;;  %1427 = vtanh.f32 %v866_v8 }
 0x190   : > { %1021 = vst.msk [vmem:[%s1756_s18 + $0x10] sm:$0xff] %vm1018_vm0, %v693_v12  ;;  %1429 = vtanh.f32 %v861_v13  ;;  %v1227_v0 = vpop.f32.mrb[4].mxu0  ;;  %v1283_v16 = vpop.f32.mrb[4].mxu1 }
 0x191   : > { %v708_v17 = vadd.f32 %v1227_v0, %v1744_v15  ;;  %v876_v19 = vadd.f32 %v1283_v16, %v1749_v14  ;;  %v702_v20 = vpop.f32.mrb[5].mxu0  ;;  %v870_v21 = vpop.f32.mrb[5].mxu1 }
 0x192   : > { %v703_v22 = vadd.f32 %v1744_v15, %v702_v20  ;;  %v871_v23 = vadd.f32 %v1749_v14, %v870_v21 }
 0x193   : > { %1024 = vst.msk [vmem:[%s1756_s18 + $0x28] sm:$0xff] %vm1018_vm0, %v708_v17  ;;  %1431 = vtanh.f32 %v876_v19 }
 0x194   : > { %v1424_v25 = vpop.eup %1423  ;;  %1023 = vst.msk [vmem:[%s1756_s18 + $0x20] sm:$0xff] %vm1018_vm0, %v703_v22  ;;  %1433 = vtanh.f32 %v871_v23 }
 0x195   : > { %v1426_v26 = vpop.eup %1425  ;;  %v953_v27 = vmul.f32 %v1424_v25, %v1781_v24 }
 0x196   : > { %v952_v28 = vmul.f32 %v1426_v26, %v1781_v24 }
 0x197   : > { %970 = vadd.xlane.f32.xlu0 %v953_v27 }
 0x198   : > { %968 = vadd.xlane.f32.xlu1 %v952_v28 }
 0x199   : > { %v1428_v10 = vpop.eup %1427 }
 0x19a   : > { %v1430_v29 = vpop.eup %1429  ;;  %v1230_v30 = vpop.f32.mrb[6].mxu0  ;;  %v955_v32 = vmul.f32 %v1428_v10, %v1781_v24 }
 0x19b   : > { %v1286_v31 = vpop.f32.mrb[6].mxu1  ;;  %v718_v33 = vadd.f32 %v1230_v30, %v1744_v15  ;;  %v712_v35 = vpop.f32.mrb[7].mxu0  ;;  %v954_v37 = vmul.f32 %v1430_v29, %v1781_v24 }
 0x19c   : > { %v886_v34 = vadd.f32 %v1286_v31, %v1749_v14  ;;  %v880_v36 = vpop.f32.mrb[7].mxu1  ;;  %v713_v38 = vadd.f32 %v1744_v15, %v712_v35  ;;  %974 = vadd.xlane.f32.xlu1 %v955_v32 }
 0x19d   : > { %v881_v39 = vadd.f32 %v1749_v14, %v880_v36  ;;  %v1432_v40 = vpop.eup %1431  ;;  %1026 = vst.msk [vmem:[%s1756_s18 + $0x38] sm:$0xff] %vm1018_vm0, %v718_v33  ;;  %972 = vadd.xlane.f32.xlu0 %v954_v37  ;;  %v1001_v33 = vstv %s1000_s19 }
 0x19e   : > { %1435 = vtanh.f32 %v886_v34  ;;  %v1434_v41 = vpop.eup %1433  ;;  %1025 = vst.msk [vmem:[%s1756_s18 + $0x30] sm:$0xff] %vm1018_vm0, %v713_v38  ;;  %v957_v42 = vmul.f32 %v1432_v40, %v1781_v24 }
 0x19f   : > { %1437 = vtanh.f32 %v881_v39  ;;  %v956_v43 = vmul.f32 %v1434_v41, %v1781_v24 }
 0x1a0   : > { %978 = vadd.xlane.f32.xlu1 %v957_v42 }
 0x1a1   : > { %976 = vadd.xlane.f32.xlu0 %v956_v43 }
 0x1a8   : > { %v1436_v44 = vpop.eup %1435  ;;  %v1233_v46 = vpop.f32.mrb[8].mxu0 }
 0x1a9   : > { %v1438_v45 = vpop.eup %1437  ;;  %v1289_v47 = vpop.f32.mrb[8].mxu1  ;;  %v959_v48 = vmul.f32 %v1436_v44, %v1781_v24  ;;  %v728_v49 = vadd.f32 %v1233_v46, %v1744_v15 }
 0x1aa   : > { %v896_v50 = vadd.f32 %v1289_v47, %v1749_v14  ;;  %v722_v51 = vpop.f32.mrb[9].mxu0  ;;  %v890_v52 = vpop.f32.mrb[9].mxu1  ;;  %v958_v53 = vmul.f32 %v1438_v45, %v1781_v24 }
 0x1ab   : > { %v723_v54 = vadd.f32 %v1744_v15, %v722_v51  ;;  %v891_v55 = vadd.f32 %v1749_v14, %v890_v52  ;;  %982 = vadd.xlane.f32.xlu1 %v959_v48  ;;  %1028 = vst.msk [vmem:[%s1756_s18 + $0x48] sm:$0xff] %vm1018_vm0, %v728_v49 }
 0x1ac   : > { %1439 = vtanh.f32 %v896_v50  ;;  %980 = vadd.xlane.f32.xlu0 %v958_v53 }
 0x1ad   : > { %1027 = vst.msk [vmem:[%s1756_s18 + $0x40] sm:$0xff] %vm1018_vm0, %v723_v54  ;;  %1441 = vtanh.f32 %v891_v55 }
 0x1b2   : > { %v1236_v56 = vpop.f32.mrb[10].mxu0  ;;  %v1292_v57 = vpop.f32.mrb[10].mxu1 }
 0x1b3   : > { %v738_v58 = vadd.f32 %v1236_v56, %v1744_v15  ;;  %v906_v59 = vadd.f32 %v1292_v57, %v1749_v14  ;;  %v732_v60 = vpop.f32.mrb[11].mxu0  ;;  %v900_v18 = vpop.f32.mrb[11].mxu1 }
 0x1b4   : > { %v733_v61 = vadd.f32 %v1744_v15, %v732_v60  ;;  %v901_v62 = vadd.f32 %v1749_v14, %v900_v18 }
 0x1b5   : > { %1030 = vst.msk [vmem:[%s1756_s18 + $0x58] sm:$0xff] %vm1018_vm0, %v738_v58  ;;  %1443 = vtanh.f32 %v906_v59 }
 0x1b6   : > { %v1440_v63 = vpop.eup %1439  ;;  %1029 = vst.msk [vmem:[%s1756_s18 + $0x50] sm:$0xff] %vm1018_vm0, %v733_v61  ;;  %1445 = vtanh.f32 %v901_v62 }
 0x1b7   : > { %v1442_v1 = vpop.eup %1441  ;;  %v961_v2 = vmul.f32 %v1440_v63, %v1781_v24 }
 0x1b8   : > { %v960_v3 = vmul.f32 %v1442_v1, %v1781_v24 }
 0x1b9   : > { %986 = vadd.xlane.f32.xlu1 %v961_v2 }
 0x1ba   : > { %984 = vadd.xlane.f32.xlu0 %v960_v3 }
 0x1bf   : > { %v1444_v4 = vpop.eup %1443 }
 0x1c0   : > { %v1446_v5 = vpop.eup %1445  ;;  %v1239_v6 = vpop.f32.mrb[12].mxu0  ;;  %v963_v8 = vmul.f32 %v1444_v4, %v1781_v24 }
 0x1c1   : > { %v1295_v7 = vpop.f32.mrb[12].mxu1  ;;  %v748_v9 = vadd.f32 %v1239_v6, %v1744_v15  ;;  %v742_v12 = vpop.f32.mrb[13].mxu0  ;;  %v962_v0 = vmul.f32 %v1446_v5, %v1781_v24 }
 0x1c2   : > { %v916_v11 = vadd.f32 %v1295_v7, %v1749_v14  ;;  %v910_v13 = vpop.f32.mrb[13].mxu1  ;;  %v743_v16 = vadd.f32 %v1744_v15, %v742_v12  ;;  %990 = vadd.xlane.f32.xlu1 %v963_v8 }
 0x1c3   : > { %v911_v17 = vadd.f32 %v1749_v14, %v910_v13  ;;  %1032 = vst.msk [vmem:[%s1756_s18 + $0x68] sm:$0xff] %vm1018_vm0, %v748_v9  ;;  %988 = vadd.xlane.f32.xlu0 %v962_v0 }
 0x1c4   : > { %1447 = vtanh.f32 %v916_v11  ;;  %1031 = vst.msk [vmem:[%s1756_s18 + $0x60] sm:$0xff] %vm1018_vm0, %v743_v16 }
 0x1c5   : > { %1449 = vtanh.f32 %v911_v17 }
 0x1ca   : > { %v1242_v19 = vpop.f32.mrb[14].mxu0  ;;  %v1298_v20 = vpop.f32.mrb[14].mxu1 }
 0x1cb   : > { %v758_v21 = vadd.f32 %v1242_v19, %v1744_v15  ;;  %v926_v22 = vadd.f32 %v1298_v20, %v1749_v14  ;;  %v752_v23 = vpop.f32.mrb[15].mxu0  ;;  %v920_v25 = vpop.f32.mrb[15].mxu1 }
 0x1cc   : > { %v753_v26 = vadd.f32 %v1744_v15, %v752_v23  ;;  %v921_v27 = vadd.f32 %v1749_v14, %v920_v25 }
 0x1cd   : > { %1034 = vst.msk [vmem:[%s1756_s18 + $0x78] sm:$0xff] %vm1018_vm0, %v758_v21  ;;  %1451 = vtanh.f32 %v926_v22 }
 0x1ce   : > { %v1448_v28 = vpop.eup %1447  ;;  %1033 = vst.msk [vmem:[%s1756_s18 + $0x70] sm:$0xff] %vm1018_vm0, %v753_v26  ;;  %1453 = vtanh.f32 %v921_v27 }
 0x1cf   : > { %v1450_v10 = vpop.eup %1449  ;;  %v965_v29 = vmul.f32 %v1448_v28, %v1781_v24 }
 0x1d0   : > { %v964_v30 = vmul.f32 %v1450_v10, %v1781_v24 }
 0x1d1   : > { %994 = vadd.xlane.f32.xlu1 %v965_v29 }
 0x1d2   : > { %992 = vadd.xlane.f32.xlu0 %v964_v30 }
 0x1d7   : > { %v1452_v31 = vpop.eup %1451 }
 0x1d8   : > { %v1454_v15 = vpop.eup %1453  ;;  %v967_v14 = vmul.f32 %v1452_v31, %v1781_v24 }
 0x1d9   : > { %v966_v32 = vmul.f32 %v1454_v15, %v1781_v24 }
 0x1da   : > { %998 = vadd.xlane.f32.xlu1 %v967_v14 }
 0x1db   : > { %996 = vadd.xlane.f32.xlu0 %v966_v32 }
 0x224   : > { %v971_v34 = vpop.xlane.xlu0 %970 }
 0x225   : > { %v1003_v35 = vadd.f32 %v1001_v33, %v971_v34  ;;  %v969_v36 = vpop.xlane.xlu1 %968 }
 0x226   : > { %v1002_v37 = vadd.f32 %v1001_v33, %v969_v36 }
 0x227   : > { %1037 = vst.msk [vmem:[%s1756_s18 + $0x8] sm:$0xff] %vm1035_vm1, %v1003_v35 }
 0x228   : > { %1036 = vst.msk [vmem:[%s1756_s18] sm:$0xff] %vm1035_vm1, %v1002_v37 }
 0x229   : > { %v975_v38 = vpop.xlane.xlu1 %974 }
 0x22a   : > { %v1005_v24 = vadd.f32 %v1001_v33, %v975_v38  ;;  %v973_v39 = vpop.xlane.xlu0 %972 }
 0x22b   : > { %v1004_v40 = vadd.f32 %v1001_v33, %v973_v39 }
 0x22c   : > { %1039 = vst.msk [vmem:[%s1756_s18 + $0x18] sm:$0xff] %vm1035_vm1, %v1005_v24 }
 0x22d   : > { %1038 = vst.msk [vmem:[%s1756_s18 + $0x10] sm:$0xff] %vm1035_vm1, %v1004_v40  ;;  %v979_v41 = vpop.xlane.xlu1 %978 }
 0x22e   : > { %v1007_v42 = vadd.f32 %v1001_v33, %v979_v41  ;;  %v977_v43 = vpop.xlane.xlu0 %976 }
 0x22f   : > { %v1006_v44 = vadd.f32 %v1001_v33, %v977_v43 }
 0x230   : > { %1041 = vst.msk [vmem:[%s1756_s18 + $0x28] sm:$0xff] %vm1035_vm1, %v1007_v42 }
 0x231   : > { %1040 = vst.msk [vmem:[%s1756_s18 + $0x20] sm:$0xff] %vm1035_vm1, %v1006_v44 }
 0x238   : > { %v983_v45 = vpop.xlane.xlu1 %982 }
 0x239   : > { %v1009_v46 = vadd.f32 %v1001_v33, %v983_v45  ;;  %v981_v47 = vpop.xlane.xlu0 %980 }
 0x23a   : > { %v1008_v48 = vadd.f32 %v1001_v33, %v981_v47 }
 0x23b   : > { %1043 = vst.msk [vmem:[%s1756_s18 + $0x38] sm:$0xff] %vm1035_vm1, %v1009_v46 }
 0x23c   : > { %1042 = vst.msk [vmem:[%s1756_s18 + $0x30] sm:$0xff] %vm1035_vm1, %v1008_v48 }
 0x246   : > { %v987_v49 = vpop.xlane.xlu1 %986 }
 0x247   : > { %v1011_v50 = vadd.f32 %v1001_v33, %v987_v49  ;;  %v985_v51 = vpop.xlane.xlu0 %984 }
 0x248   : > { %v1010_v52 = vadd.f32 %v1001_v33, %v985_v51 }
 0x249   : > { %1045 = vst.msk [vmem:[%s1756_s18 + $0x48] sm:$0xff] %vm1035_vm1, %v1011_v50 }
 0x24a   : > { %1044 = vst.msk [vmem:[%s1756_s18 + $0x40] sm:$0xff] %vm1035_vm1, %v1010_v52 }
 0x24f   : > { %v991_v53 = vpop.xlane.xlu1 %990 }
 0x250   : > { %v1013_v54 = vadd.f32 %v1001_v33, %v991_v53  ;;  %v989_v55 = vpop.xlane.xlu0 %988 }
 0x251   : > { %v1012_v56 = vadd.f32 %v1001_v33, %v989_v55 }
 0x252   : > { %1047 = vst.msk [vmem:[%s1756_s18 + $0x58] sm:$0xff] %vm1035_vm1, %v1013_v54 }
 0x253   : > { %1046 = vst.msk [vmem:[%s1756_s18 + $0x50] sm:$0xff] %vm1035_vm1, %v1012_v56 }
 0x25e   : > { %v995_v57 = vpop.xlane.xlu1 %994 }
 0x25f   : > { %v1015_v58 = vadd.f32 %v1001_v33, %v995_v57  ;;  %v993_v59 = vpop.xlane.xlu0 %992 }
 0x260   : > { %v1014_v60 = vadd.f32 %v1001_v33, %v993_v59 }
 0x261   : > { %1049 = vst.msk [vmem:[%s1756_s18 + $0x68] sm:$0xff] %vm1035_vm1, %v1015_v58 }
 0x262   : > { %1048 = vst.msk [vmem:[%s1756_s18 + $0x60] sm:$0xff] %vm1035_vm1, %v1014_v60 }
 0x267   : > { %v999_v18 = vpop.xlane.xlu1 %998 }
 0x268   : > { %v1017_v61 = vadd.f32 %v1001_v33, %v999_v18  ;;  %v997_v62 = vpop.xlane.xlu0 %996 }
 0x269   : > { %v1016_v63 = vadd.f32 %v1001_v33, %v997_v62 }
 0x26a   : > { %1051 = vst.msk [vmem:[%s1756_s18 + $0x78] sm:$0xff] %vm1035_vm1, %v1017_v61 }
 0x26b   : > { %1050 = vst.msk [vmem:[%s1756_s18 + $0x70] sm:$0xff] %vm1035_vm1, %v1016_v63 }
 0x26c PF: > { %s20_s11 = sadd.s32 1, %s1461_s11  }
 0x26d   : > { %p17_p4 = scmp.ge.s32.totalorder %s20_s11, 4  }
 0x26f   :  { %19 = sbr.rel (!%p17_p4) target bundleno = 2 (0x2), region = 86 }

</bundles_post_ra>
